<compile_context>
chip_gen: v6e
topology: v6e:2x2x1
jax: 0.10.0
libtpu: 0.0.40
codegen_flags: <defaults>
</compile_context>

<pallas_src>
import math
import numpy as np
import jax
import jax.numpy as jnp
from jax.experimental import pallas as pl
from jax.experimental.pallas import tpu as pltpu


def _interp_matrix(in_size, out_size, scale):
    """PyTorch F.interpolate(mode='bilinear', align_corners=False) 1-D weights.

    Returns A of shape (out_size, in_size) with at most two non-zeros per row,
    so that  out = A @ in  reproduces 1-D linear interpolation exactly.
    """
    out_idx = np.arange(out_size, dtype=np.float64)
    src = (out_idx + 0.5) / float(scale) - 0.5
    src = np.clip(src, 0.0, in_size - 1)
    i0 = np.floor(src).astype(np.int64)
    i1 = np.minimum(i0 + 1, in_size - 1)
    w1 = src - i0
    w0 = 1.0 - w1
    a = np.zeros((out_size, in_size), dtype=np.float64)
    a[np.arange(out_size), i0] += w0
    a[np.arange(out_size), i1] += w1
    return jnp.asarray(a, dtype=jnp.float32)


def _resize_kernel(ah_ref, awt_ref, x_ref, o_ref):
    """ah_ref:(Ho,Hi)  awt_ref:(Wi,Wo)  x_ref:(TB,Hi,Wi)  o_ref:(TB,Ho,Wo)."""
    ah = ah_ref[...]                          # (Ho, Hi) f32, resident across grid
    awt = awt_ref[...]                        # (Wi, Wo) f32
    tb, hi, wi = x_ref.shape
    ho = ah.shape[0]
    wo = awt.shape[1]

    # Width pass: ONE fused MXU matmul for the whole batch tile.
    x = x_ref[...].astype(jnp.float32).reshape(tb * hi, wi)      # free leading-dim collapse
    y = jnp.dot(x, awt, preferred_element_type=jnp.float32)      # (TB*Hi, Wo)
    y = y.reshape(tb, hi, wo)

    # Height pass: per-image small matmul, each ending in a single lane-dense
    # (full-Wo) store.  tb is kept small (<=8) so the static unroll stays cheap.
    for b in range(tb):
        o_ref[b] = jnp.dot(ah, y[b],
                           preferred_element_type=jnp.float32).astype(o_ref.dtype)


def _pick_batch_tile(batch, per_img_bytes, budget_bytes=4 << 20, max_tb=8):
    cap = max(1, min(max_tb, budget_bytes // max(per_img_bytes, 1)))
    tb = 1
    for d in range(1, batch + 1):
        if batch % d == 0 and d <= cap:
            tb = d
    return tb


def bilinear_resize_nchw(x, scale_factor):
    """F.interpolate(x, scale_factor, mode='bilinear', align_corners=False) via Pallas."""
    n, c, hi, wi = x.shape
    ho = int(math.floor(hi * scale_factor))
    wo = int(math.floor(wi * scale_factor))
    assert ho >= 1 and wo >= 1, "scale_factor produces empty output"

    ah = _interp_matrix(hi, ho, scale_factor)          # (Ho, Hi)
    awt = _interp_matrix(wi, wo, scale_factor).T       # (Wi, Wo)

    b = n * c
    x3 = x.reshape(b, hi, wi)                          # free metadata reshape

    per_img_bytes = 4 * (hi * wi + hi * wo + ho * wo)
    tb = _pick_batch_tile(b, per_img_bytes)

    # Explicit scoped-VMEM budget: double-buffered in/out blocks + weight
    # matrices + the live width-pass intermediate, with headroom (clamped to
    # the v7x 64 MiB physical per-TC ceiling).
    block_bytes = 4 * tb * (hi * wi + ho * wo)
    mats_bytes = 4 * (ho * hi + wi * wo)
    tmp_bytes = 4 * tb * hi * wo
    vmem_limit = int(min(max(2 * block_bytes + 2 * mats_bytes + tmp_bytes + (4 << 20),
                             16 << 20), 64 << 20))

    out = pl.pallas_call(
        _resize_kernel,
        out_shape=jax.ShapeDtypeStruct((b, ho, wo), x.dtype),
        grid_spec=pltpu.PrefetchScalarGridSpec(
            num_scalar_prefetch=0,
            grid=(b // tb,),
            in_specs=[
                pl.BlockSpec((ho, hi), lambda i: (0, 0)),       # A_h, resident
                pl.BlockSpec((wi, wo), lambda i: (0, 0)),       # A_w^T, resident
                pl.BlockSpec((tb, hi, wi), lambda i: (i, 0, 0)),
            ],
            out_specs=pl.BlockSpec((tb, ho, wo), lambda i: (i, 0, 0)),
        ),
        compiler_params=pltpu.CompilerParams(
            dimension_semantics=("parallel",),
            vmem_limit_bytes=vmem_limit,
        ),
    )(ah, awt, x3)

    return out.reshape(n, c, ho, wo)


class Resize:
    """JAX/Pallas port of the PyTorch Resize module (I/O layout: NCHW)."""

    def __init__(self, in_channels=None, learned=False, mode="bilinear"):
        # TODO(synk): the learned (Conv2d) branch raises NotImplementedError in
        # the PyTorch spec itself, so it is intentionally not implemented here.
        assert not learned, "learned resize is NotImplementedError in the spec"
        if mode != "bilinear":
            # TODO(synk): only the default 'bilinear' (align_corners=False) mode
            # is implemented; other modes would only change the weight matrices.
            raise NotImplementedError(f"mode={mode}")
        self.with_conv = learned
        self.mode = mode

    def __call__(self, x, scale_factor=1.0):
        if scale_factor == 1.0:
            return x
        return bilinear_resize_nchw(x, scale_factor)


def _bilinear_ref(x, scale):
    """Gather-based reference of PyTorch bilinear interpolate, align_corners=False."""
    n, c, h, w = x.shape
    ho = int(math.floor(h * scale))
    wo = int(math.floor(w * scale))

    def coords(out_size, in_size):
        idx = jnp.arange(out_size, dtype=jnp.float32)
        src = (idx + 0.5) / scale - 0.5
        src = jnp.clip(src, 0.0, in_size - 1)
        i0 = jnp.floor(src).astype(jnp.int32)
        i1 = jnp.minimum(i0 + 1, in_size - 1)
        w1 = src - i0.astype(jnp.float32)
        return i0, i1, 1.0 - w1, w1

    h0, h1, wh0, wh1 = coords(ho, h)
    w0, w1, ww0, ww1 = coords(wo, w)

    def g(hi_, wi_):
        return x[:, :, hi_[:, None], wi_[None, :]]

    out = (g(h0, w0) * (wh0[:, None] * ww0[None, :])[None, None]
           + g(h0, w1) * (wh0[:, None] * ww1[None, :])[None, None]
           + g(h1, w0) * (wh1[:, None] * ww0[None, :])[None, None]
           + g(h1, w1) * (wh1[:, None] * ww1[None, :])[None, None])
    return out


if __name__ == "__main__":
    key = jax.random.PRNGKey(0)
    N, C, H, W = 2, 4, 16, 16
    x = jax.random.normal(key, (N, C, H, W), jnp.float32)

    mod = Resize(in_channels=None, learned=False, mode="bilinear")

    # scale_factor == 1.0 -> identity shortcut (module semantics)
    y_id = mod(x, scale_factor=1.0)
    assert y_id.shape == x.shape
    assert float(jnp.max(jnp.abs(y_id - x))) == 0.0

    for scale in (2.0, 1.5):
        y = jax.block_until_ready(mod(x, scale_factor=scale))
        ho = int(math.floor(H * scale))
        wo = int(math.floor(W * scale))
        assert y.shape == (N, C, ho, wo), y.shape
        ref = _bilinear_ref(x, scale)
        err = float(jnp.max(jnp.abs(y - ref)))
        assert err < 1e-4, f"scale={scale}: max abs err {err}"

    print("KERNEL_OK")
</pallas_src>

<mosaic_0001>
module attributes {stable_mosaic.version = 11 : i64} {
  func.func @_resize_kernel(%arg0: i32, %arg1: memref<32x16xf32, #tpu.memory_space<vmem>>, %arg2: memref<16x32xf32, #tpu.memory_space<vmem>>, %arg3: memref<8x16x16xf32, #tpu.memory_space<vmem>>, %arg4: memref<8x32x32xf32, #tpu.memory_space<vmem>>) attributes {dimension_semantics = [#tpu.dimension_semantics<parallel>], iteration_bounds = array<i64: 1>, scalar_prefetch = 0 : i64, scratch_operands = 0 : i64, tpu.core_type = #tpu.core_type<tc>, window_params = [{pipeline_mode = #tpu.pipeline_mode<synchronous>, transform_indices = @transform_0, window_bounds = array<i64: 32, 16>}, {pipeline_mode = #tpu.pipeline_mode<synchronous>, transform_indices = @transform_1, window_bounds = array<i64: 16, 32>}, {transform_indices = @transform_2, window_bounds = array<i64: 8, 16, 16>}, {transform_indices = @transform_3, window_bounds = array<i64: 8, 32, 32>}]} {
    %c0 = arith.constant 0 : index
    %c0_0 = arith.constant 0 : index
    %0 = vector.load %arg1[%c0, %c0_0] : memref<32x16xf32, #tpu.memory_space<vmem>>, vector<32x16xf32>
    %c0_1 = arith.constant 0 : index
    %c0_2 = arith.constant 0 : index
    %1 = vector.load %arg2[%c0_1, %c0_2] : memref<16x32xf32, #tpu.memory_space<vmem>>, vector<16x32xf32>
    %c0_3 = arith.constant 0 : index
    %c0_4 = arith.constant 0 : index
    %c0_5 = arith.constant 0 : index
    %2 = vector.load %arg3[%c0_3, %c0_4, %c0_5] : memref<8x16x16xf32, #tpu.memory_space<vmem>>, vector<8x16x16xf32>
    %3 = vector.shape_cast %2 : vector<8x16x16xf32> to vector<128x16xf32>
    %cst = arith.constant dense<0.000000e+00> : vector<128x32xf32>
    %4 = tpu.matmul %3, %1, %cst {dimension_numbers = #tpu.dot_dimension_numbers<[1], [0], [0], [1], [0, 0, 1, 1], [], []>} : vector<128x16xf32>, vector<16x32xf32>, vector<128x32xf32> -> vector<128x32xf32>
    %5 = vector.shape_cast %4 : vector<128x32xf32> to vector<8x16x32xf32>
    %6 = vector.extract_strided_slice %5 {offsets = [0, 0, 0], sizes = [1, 16, 32], strides = [1, 1, 1]} : vector<8x16x32xf32> to vector<1x16x32xf32>
    %7 = vector.shape_cast %6 : vector<1x16x32xf32> to vector<16x32xf32>
    %cst_6 = arith.constant dense<0.000000e+00> : vector<32x32xf32>
    %8 = tpu.matmul %0, %7, %cst_6 {dimension_numbers = #tpu.dot_dimension_numbers<[1], [0], [0], [1], [0, 0, 1, 1], [], []>} : vector<32x16xf32>, vector<16x32xf32>, vector<32x32xf32> -> vector<32x32xf32>
    %c0_7 = arith.constant 0 : index
    %c0_8 = arith.constant 0 : index
    %c0_9 = arith.constant 0 : index
    %9 = vector.load %arg4[%c0_7, %c0_8, %c0_9] : memref<8x32x32xf32, #tpu.memory_space<vmem>>, vector<1x32x32xf32>
    %10 = vector.shape_cast %9 : vector<1x32x32xf32> to vector<32x32xf32>
    %11 = vector.shape_cast %8 : vector<32x32xf32> to vector<1x32x32xf32>
    tpu.vector_store %arg4[%c0_7, %c0_8, %c0_9], %11 {strides = array<i32>} : memref<8x32x32xf32, #tpu.memory_space<vmem>>, vector<1x32x32xf32>,
    %12 = vector.extract_strided_slice %5 {offsets = [1, 0, 0], sizes = [1, 16, 32], strides = [1, 1, 1]} : vector<8x16x32xf32> to vector<1x16x32xf32>
    %13 = vector.shape_cast %12 : vector<1x16x32xf32> to vector<16x32xf32>
    %cst_10 = arith.constant dense<0.000000e+00> : vector<32x32xf32>
    %14 = tpu.matmul %0, %13, %cst_10 {dimension_numbers = #tpu.dot_dimension_numbers<[1], [0], [0], [1], [0, 0, 1, 1], [], []>} : vector<32x16xf32>, vector<16x32xf32>, vector<32x32xf32> -> vector<32x32xf32>
    %c1 = arith.constant 1 : index
    %c0_11 = arith.constant 0 : index
    %c0_12 = arith.constant 0 : index
    %15 = vector.load %arg4[%c1, %c0_11, %c0_12] : memref<8x32x32xf32, #tpu.memory_space<vmem>>, vector<1x32x32xf32>
    %16 = vector.shape_cast %15 : vector<1x32x32xf32> to vector<32x32xf32>
    %17 = vector.shape_cast %14 : vector<32x32xf32> to vector<1x32x32xf32>
    tpu.vector_store %arg4[%c1, %c0_11, %c0_12], %17 {strides = array<i32>} : memref<8x32x32xf32, #tpu.memory_space<vmem>>, vector<1x32x32xf32>,
    %18 = vector.extract_strided_slice %5 {offsets = [2, 0, 0], sizes = [1, 16, 32], strides = [1, 1, 1]} : vector<8x16x32xf32> to vector<1x16x32xf32>
    %19 = vector.shape_cast %18 : vector<1x16x32xf32> to vector<16x32xf32>
    %cst_13 = arith.constant dense<0.000000e+00> : vector<32x32xf32>
    %20 = tpu.matmul %0, %19, %cst_13 {dimension_numbers = #tpu.dot_dimension_numbers<[1], [0], [0], [1], [0, 0, 1, 1], [], []>} : vector<32x16xf32>, vector<16x32xf32>, vector<32x32xf32> -> vector<32x32xf32>
    %c2 = arith.constant 2 : index
    %c0_14 = arith.constant 0 : index
    %c0_15 = arith.constant 0 : index
    %21 = vector.load %arg4[%c2, %c0_14, %c0_15] : memref<8x32x32xf32, #tpu.memory_space<vmem>>, vector<1x32x32xf32>
    %22 = vector.shape_cast %21 : vector<1x32x32xf32> to vector<32x32xf32>
    %23 = vector.shape_cast %20 : vector<32x32xf32> to vector<1x32x32xf32>
    tpu.vector_store %arg4[%c2, %c0_14, %c0_15], %23 {strides = array<i32>} : memref<8x32x32xf32, #tpu.memory_space<vmem>>, vector<1x32x32xf32>,
    %24 = vector.extract_strided_slice %5 {offsets = [3, 0, 0], sizes = [1, 16, 32], strides = [1, 1, 1]} : vector<8x16x32xf32> to vector<1x16x32xf32>
    %25 = vector.shape_cast %24 : vector<1x16x32xf32> to vector<16x32xf32>
    %cst_16 = arith.constant dense<0.000000e+00> : vector<32x32xf32>
    %26 = tpu.matmul %0, %25, %cst_16 {dimension_numbers = #tpu.dot_dimension_numbers<[1], [0], [0], [1], [0, 0, 1, 1], [], []>} : vector<32x16xf32>, vector<16x32xf32>, vector<32x32xf32> -> vector<32x32xf32>
    %c3 = arith.constant 3 : index
    %c0_17 = arith.constant 0 : index
    %c0_18 = arith.constant 0 : index
    %27 = vector.load %arg4[%c3, %c0_17, %c0_18] : memref<8x32x32xf32, #tpu.memory_space<vmem>>, vector<1x32x32xf32>
    %28 = vector.shape_cast %27 : vector<1x32x32xf32> to vector<32x32xf32>
    %29 = vector.shape_cast %26 : vector<32x32xf32> to vector<1x32x32xf32>
    tpu.vector_store %arg4[%c3, %c0_17, %c0_18], %29 {strides = array<i32>} : memref<8x32x32xf32, #tpu.memory_space<vmem>>, vector<1x32x32xf32>,
    %30 = vector.extract_strided_slice %5 {offsets = [4, 0, 0], sizes = [1, 16, 32], strides = [1, 1, 1]} : vector<8x16x32xf32> to vector<1x16x32xf32>
    %31 = vector.shape_cast %30 : vector<1x16x32xf32> to vector<16x32xf32>
    %cst_19 = arith.constant dense<0.000000e+00> : vector<32x32xf32>
    %32 = tpu.matmul %0, %31, %cst_19 {dimension_numbers = #tpu.dot_dimension_numbers<[1], [0], [0], [1], [0, 0, 1, 1], [], []>} : vector<32x16xf32>, vector<16x32xf32>, vector<32x32xf32> -> vector<32x32xf32>
    %c4 = arith.constant 4 : index
    %c0_20 = arith.constant 0 : index
    %c0_21 = arith.constant 0 : index
    %33 = vector.load %arg4[%c4, %c0_20, %c0_21] : memref<8x32x32xf32, #tpu.memory_space<vmem>>, vector<1x32x32xf32>
    %34 = vector.shape_cast %33 : vector<1x32x32xf32> to vector<32x32xf32>
    %35 = vector.shape_cast %32 : vector<32x32xf32> to vector<1x32x32xf32>
    tpu.vector_store %arg4[%c4, %c0_20, %c0_21], %35 {strides = array<i32>} : memref<8x32x32xf32, #tpu.memory_space<vmem>>, vector<1x32x32xf32>,
    %36 = vector.extract_strided_slice %5 {offsets = [5, 0, 0], sizes = [1, 16, 32], strides = [1, 1, 1]} : vector<8x16x32xf32> to vector<1x16x32xf32>
    %37 = vector.shape_cast %36 : vector<1x16x32xf32> to vector<16x32xf32>
    %cst_22 = arith.constant dense<0.000000e+00> : vector<32x32xf32>
    %38 = tpu.matmul %0, %37, %cst_22 {dimension_numbers = #tpu.dot_dimension_numbers<[1], [0], [0], [1], [0, 0, 1, 1], [], []>} : vector<32x16xf32>, vector<16x32xf32>, vector<32x32xf32> -> vector<32x32xf32>
    %c5 = arith.constant 5 : index
    %c0_23 = arith.constant 0 : index
    %c0_24 = arith.constant 0 : index
    %39 = vector.load %arg4[%c5, %c0_23, %c0_24] : memref<8x32x32xf32, #tpu.memory_space<vmem>>, vector<1x32x32xf32>
    %40 = vector.shape_cast %39 : vector<1x32x32xf32> to vector<32x32xf32>
    %41 = vector.shape_cast %38 : vector<32x32xf32> to vector<1x32x32xf32>
    tpu.vector_store %arg4[%c5, %c0_23, %c0_24], %41 {strides = array<i32>} : memref<8x32x32xf32, #tpu.memory_space<vmem>>, vector<1x32x32xf32>,
    %42 = vector.extract_strided_slice %5 {offsets = [6, 0, 0], sizes = [1, 16, 32], strides = [1, 1, 1]} : vector<8x16x32xf32> to vector<1x16x32xf32>
    %43 = vector.shape_cast %42 : vector<1x16x32xf32> to vector<16x32xf32>
    %cst_25 = arith.constant dense<0.000000e+00> : vector<32x32xf32>
    %44 = tpu.matmul %0, %43, %cst_25 {dimension_numbers = #tpu.dot_dimension_numbers<[1], [0], [0], [1], [0, 0, 1, 1], [], []>} : vector<32x16xf32>, vector<16x32xf32>, vector<32x32xf32> -> vector<32x32xf32>
    %c6 = arith.constant 6 : index
    %c0_26 = arith.constant 0 : index
    %c0_27 = arith.constant 0 : index
    %45 = vector.load %arg4[%c6, %c0_26, %c0_27] : memref<8x32x32xf32, #tpu.memory_space<vmem>>, vector<1x32x32xf32>
    %46 = vector.shape_cast %45 : vector<1x32x32xf32> to vector<32x32xf32>
    %47 = vector.shape_cast %44 : vector<32x32xf32> to vector<1x32x32xf32>
    tpu.vector_store %arg4[%c6, %c0_26, %c0_27], %47 {strides = array<i32>} : memref<8x32x32xf32, #tpu.memory_space<vmem>>, vector<1x32x32xf32>,
    %48 = vector.extract_strided_slice %5 {offsets = [7, 0, 0], sizes = [1, 16, 32], strides = [1, 1, 1]} : vector<8x16x32xf32> to vector<1x16x32xf32>
    %49 = vector.shape_cast %48 : vector<1x16x32xf32> to vector<16x32xf32>
    %cst_28 = arith.constant dense<0.000000e+00> : vector<32x32xf32>
    %50 = tpu.matmul %0, %49, %cst_28 {dimension_numbers = #tpu.dot_dimension_numbers<[1], [0], [0], [1], [0, 0, 1, 1], [], []>} : vector<32x16xf32>, vector<16x32xf32>, vector<32x32xf32> -> vector<32x32xf32>
    %c7 = arith.constant 7 : index
    %c0_29 = arith.constant 0 : index
    %c0_30 = arith.constant 0 : index
    %51 = vector.load %arg4[%c7, %c0_29, %c0_30] : memref<8x32x32xf32, #tpu.memory_space<vmem>>, vector<1x32x32xf32>
    %52 = vector.shape_cast %51 : vector<1x32x32xf32> to vector<32x32xf32>
    %53 = vector.shape_cast %50 : vector<32x32xf32> to vector<1x32x32xf32>
    tpu.vector_store %arg4[%c7, %c0_29, %c0_30], %53 {strides = array<i32>} : memref<8x32x32xf32, #tpu.memory_space<vmem>>, vector<1x32x32xf32>,
    return
  }
  func.func @transform_0(%arg0: i32) -> (i32, i32) {
    %c0_i32 = arith.constant 0 : i32
    %c0_i32_0 = arith.constant 0 : i32
    %c0_i32_1 = arith.constant 0 : i32
    return %c0_i32, %c0_i32_0 : i32, i32
  }
  func.func @transform_1(%arg0: i32) -> (i32, i32) {
    %c0_i32 = arith.constant 0 : i32
    %c0_i32_0 = arith.constant 0 : i32
    %c0_i32_1 = arith.constant 0 : i32
    return %c0_i32, %c0_i32_0 : i32, i32
  }
  func.func @transform_2(%arg0: i32) -> (i32, i32, i32) {
    %c0_i32 = arith.constant 0 : i32
    %c0_i32_0 = arith.constant 0 : i32
    %c0_i32_1 = arith.constant 0 : i32
    return %arg0, %c0_i32, %c0_i32_0 : i32, i32, i32
  }
  func.func @transform_3(%arg0: i32) -> (i32, i32, i32) {
    %c0_i32 = arith.constant 0 : i32
    %c0_i32_0 = arith.constant 0 : i32
    %c0_i32_1 = arith.constant 0 : i32
    return %arg0, %c0_i32, %c0_i32_0 : i32, i32, i32
  }
}

</mosaic_0001>

<bundles_post_ra>
// kernel: tpu_custom_call.1
= control target key start
LH: loop header
LB: loop body
LE: loop exit
PB: predicated region body
PF: predicated region fallthrough
CT: control target
= control target key end

     0   :  { %8 = vsyncpa [#allocation3], 0  ;;  %s1438_s0 = inlined_call_operand.vmem [shape: f32[32,16], index: 0, kind: input, shape index: {}]   ;;  %s1439_s1 = inlined_call_operand.vmem [shape: f32[16,32], index: 1, kind: input, shape index: {}]   ;;  %s1440_s2 = inlined_call_operand.hbm [shape: f32[8,16,16], index: 2, kind: input, shape index: {}]   ;;  %s1441_s3 = inlined_call_operand.hbm [shape: f32[8,32,32], index: 3, kind: output, shape index: {}]  }
   0x1   :  { %9 = vsyncpa [#allocation4], 0  ;;  %s1264_s12 = smov [#allocation2]  }
   0x2   :  { %s19_s13 = sshll.u32 %s1264_s12, 4  ;;  %s20_s13 = int_to_ptr.vmem [resolvable:$true] %s19_s13 }
   0x3   :  { %s1228_s14 = scalar_lea.vmem %s20_s13, 2048  ;;  %p1233_p1 = scmp.lt.s32.totalorder %s20_s13, %s20_s13 }
   0x4   :  { %p1229_p0 = scmp.ne.s32.totalorder %s20_s13, %s1228_s14  ;;  %p1234_p2 = scmp.lt.s32.totalorder %s1228_s14, %s1228_s14 }
   0x6   :  { %p1235_p3 = por %p1234_p2, %p1233_p1 }
   0x8   :  { %p1236_p4 = pnand %p1235_p3, %p1229_p0 }
   0xa   :  { %1239 = shalt.err (!%p1236_p4)
}
   0xb   :  { %s1265_s15 = smov 128   ;;  %s1266_s16 = smov 8  }
   0xc   :  { %25 = dma.hbm_to_vmem [thread:$0]  %s1440_s2, 2048, %s20_s13, [#allocation3], %s1265_s15, %s1265_s15, %s1266_s16  }
   0xd   :  { %1260 = dma.done.wait [#allocation3], 2048  }
   0xe   :  { %1261 = vsyncadd [#allocation3], 4294965248  ;;  %vm51_vm0 = vcmask 130048   ;;  %v34_v0 = vld [vmem:[%s1439_s1 + $0x8] sm:$0xff]  ;;  %v33_v1 = vld [vmem:[%s1439_s1] sm:$0xff]  ;;  %vm342_vm1 = vcmask 261120  }
   0xf   :  { %v35_v2 = vld [vmem:[#allocation2] sm:$0xff]  ;;  %1108 = vmatprep.subr.mxu0 %v34_v0  ;;  %v36_v3 = vld [vmem:[#allocation2 + $0x8] sm:$0xff]  ;;  %v37_v4 = vld [vmem:[#allocation2 + $0x10] sm:$0xff] }
  0x10   :  { %1112 = vmatprep.mubr.msk.f32.mxu0 %vm51_vm0, %v35_v2  ;;  %1109 = vmatpush3.msra.mxu0 %v34_v0  ;;  %v38_v5 = vld [vmem:[#allocation2 + $0x18] sm:$0xff]  ;;  %v39_v6 = vld [vmem:[#allocation2 + $0x20] sm:$0xff]  ;;  %v40_v7 = vld [vmem:[#allocation2 + $0x28] sm:$0xff] }
  0x11   :  { %1110 = vmatprep.subr.mxu0 %v33_v1  ;;  %v41_v8 = vld [vmem:[#allocation2 + $0x30] sm:$0xff]  ;;  %v42_v9 = vld [vmem:[#allocation2 + $0x38] sm:$0xff]  ;;  %v43_v10 = vld [vmem:[#allocation2 + $0x40] sm:$0xff] }
  0x12   :  { %1111 = vmatpush3.msra.mxu0 %v33_v1  ;;  %v44_v11 = vld [vmem:[#allocation2 + $0x48] sm:$0xff]  ;;  %v45_v12 = vld [vmem:[#allocation2 + $0x50] sm:$0xff]  ;;  %v46_v13 = vld [vmem:[#allocation2 + $0x58] sm:$0xff] }
  0x13   :  { %1113 = vmatmul.mubr.msk.f32.vlgmr.msra.gmra.mxu0 %vm51_vm0, %v36_v3  ;;  %v47_v14 = vld [vmem:[#allocation2 + $0x60] sm:$0xff]  ;;  %v48_v15 = vld [vmem:[#allocation2 + $0x68] sm:$0xff]  ;;  %v49_v16 = vld [vmem:[#allocation2 + $0x70] sm:$0xff] }
  0x14   :  { %1115 = vmatprep.mubr.msk.f32.mxu0 %vm51_vm0, %v37_v4  ;;  %v50_v17 = vld [vmem:[#allocation2 + $0x78] sm:$0xff]  ;;  %v1319_v18 = vld [vmem:[%s1438_s0] sm:$0xff]  ;;  %v1328_v21 = vld [vmem:[%s1438_s0 + $0x8] sm:$0xff] }
  0x15   :  { %1140 = vmatprep.mubr.msk.f32.mxu1 %vm51_vm0, %v1319_v18  ;;  %v1333_v22 = vld [vmem:[%s1438_s0 + $0x10] sm:$0xff]  ;;  %v1342_v25 = vld [vmem:[%s1438_s0 + $0x18] sm:$0xff]  ;;  %s1267_s0 = smov [#allocation5]  }
  0x16   :  { %s982_s29 = sshll.u32 %s1267_s0, 4  ;;  %s983_s29 = int_to_ptr.vmem [resolvable:$true] %s982_s29 }
  0x17   :  { %1116 = vmatmul.mubr.msk.f32.gmra.mxu0 %vm51_vm0, %v38_v5  ;;  %s1240_s30 = scalar_lea.vmem %s983_s29, 4096  ;;  %p1245_p6 = scmp.lt.s32.totalorder %s983_s29, %s983_s29 }
  0x18   :  { %1118 = vmatprep.mubr.msk.f32.mxu0 %vm51_vm0, %v39_v6  ;;  %p1241_p5 = scmp.ne.s32.totalorder %s983_s29, %s1240_s30  ;;  %p1246_p7 = scmp.lt.s32.totalorder %s1240_s30, %s1240_s30 }
  0x1a   :  { %p1247_p8 = por %p1246_p7, %p1245_p6 }
  0x1b   :  { %1119 = vmatmul.mubr.msk.f32.gmra.mxu0 %vm51_vm0, %v40_v7 }
  0x1c   :  { %1121 = vmatprep.mubr.msk.f32.mxu0 %vm51_vm0, %v41_v8  ;;  %p1248_p9 = pnand %p1247_p8, %p1241_p5 }
  0x1f   :  { %1122 = vmatmul.mubr.msk.f32.gmra.mxu0 %vm51_vm0, %v42_v9 }
  0x20   :  { %1124 = vmatprep.mubr.msk.f32.mxu0 %vm51_vm0, %v43_v10 }
  0x23   :  { %1125 = vmatmul.mubr.msk.f32.gmra.mxu0 %vm51_vm0, %v44_v11 }
  0x24   :  { %1127 = vmatprep.mubr.msk.f32.mxu0 %vm51_vm0, %v45_v12 }
  0x27   :  { %1128 = vmatmul.mubr.msk.f32.gmra.mxu0 %vm51_vm0, %v46_v13 }
  0x28   :  { %1130 = vmatprep.mubr.msk.f32.mxu0 %vm51_vm0, %v47_v14 }
  0x2b   :  { %1131 = vmatmul.mubr.msk.f32.gmra.mxu0 %vm51_vm0, %v48_v15 }
  0x2c   :  { %1133 = vmatprep.mubr.msk.f32.mxu0 %vm51_vm0, %v49_v16 }
  0x2f   :  { %1134 = vmatmul.mubr.msk.f32.gmra.mxu0 %vm51_vm0, %v50_v17 }
  0x30   :  { %1180 = vmatprep.mubr.msk.f32.mxu0 %vm51_vm0, %v1319_v18 }
  0xd3   :  { %v1114_v19 = vpop.f32.mrf.mxu0 }
  0xd4   :  { %1136 = vmatprep.subr.mxu1 %v1114_v19 }
  0xd5   :  { %v166_v20 = vpop.f32.mrf.mxu0  ;;  %1137 = vmatpush3.msra.mxu1 %v1114_v19 }
  0xd6   :  { %1138 = vmatprep.subr.mxu1 %v166_v20 }
  0xd7   :  { %v1117_v23 = vpop.f32.mrf.mxu0  ;;  %1139 = vmatpush3.msra.mxu1 %v166_v20 }
  0xd8   :  { %1141 = vmatmul.mubr.msk.f32.vlgmr.msra.gmra.mxu1 %vm51_vm0, %v1328_v21  ;;  %1146 = vmatprep.subr.mxu1 %v1117_v23 }
  0xd9   :  { %v176_v24 = vpop.f32.mrf.mxu0  ;;  %1147 = vmatpush3.msra.mxu1 %v1117_v23  ;;  %1143 = vmatprep.mubr.msk.f32.mxu1 %vm51_vm0, %v1333_v22 }
  0xda   :  { %1148 = vmatprep.subr.mxu1 %v176_v24 }
  0xdb   :  { %v1120_v26 = vpop.f32.mrf.mxu0  ;;  %1149 = vmatpush3.msra.mxu1 %v176_v24 }
  0xdc   :  { %1144 = vmatmul.mubr.msk.f32.gmra.mxu1 %vm51_vm0, %v1342_v25  ;;  %1156 = vmatprep.subr.mxu1 %v1120_v26 }
  0xdd   :  { %v186_v27 = vpop.f32.mrf.mxu0  ;;  %1150 = vmatprep.mubr.msk.f32.mxu1 %vm51_vm0, %v1319_v18 }
  0xdf   :  { %v1123_v28 = vpop.f32.mrf.mxu0 }
  0xe0   :  { %1151 = vmatmul.mubr.msk.f32.vlgmr.msra.gmra.mxu1 %vm51_vm0, %v1328_v21 }
  0xe1   :  { %1157 = vmatpush3.msra.mxu1 %v1120_v26  ;;  %v196_v29 = vpop.f32.mrf.mxu0  ;;  %1153 = vmatprep.mubr.msk.f32.mxu1 %vm51_vm0, %v1333_v22 }
  0xe2   :  { %1158 = vmatprep.subr.mxu1 %v186_v27 }
  0xe3   :  { %1159 = vmatpush3.msra.mxu1 %v186_v27  ;;  %v1126_v30 = vpop.f32.mrf.mxu0 }
  0xe4   :  { %1166 = vmatprep.subr.mxu1 %v1123_v28  ;;  %1154 = vmatmul.mubr.msk.f32.gmra.mxu1 %vm51_vm0, %v1342_v25 }
  0xe5   :  { %1176 = vmatprep.subr.mxu0 %v1126_v30  ;;  %v206_v31 = vpop.f32.mrf.mxu0  ;;  %1160 = vmatprep.mubr.msk.f32.mxu1 %vm51_vm0, %v1319_v18 }
  0xe6   :  { %1177 = vmatpush3.msra.mxu0 %v1126_v30 }
  0xe7   :  { %1178 = vmatprep.subr.mxu0 %v206_v31  ;;  %v1129_v32 = vpop.f32.mrf.mxu0 }
  0xe8   :  { %1179 = vmatpush3.msra.mxu0 %v206_v31  ;;  %1161 = vmatmul.mubr.msk.f32.vlgmr.msra.gmra.mxu1 %vm51_vm0, %v1328_v21 }
  0xe9   :  { %1167 = vmatpush3.msra.mxu1 %v1123_v28  ;;  %1163 = vmatprep.mubr.msk.f32.mxu1 %vm51_vm0, %v1333_v22  ;;  %v216_v33 = vpop.f32.mrf.mxu0 }
  0xea   :  { %1168 = vmatprep.subr.mxu1 %v196_v29  ;;  %1181 = vmatmul.mubr.msk.f32.vlgmr.msra.gmra.mxu0 %vm51_vm0, %v1328_v21 }
  0xeb   :  { %1169 = vmatpush3.msra.mxu1 %v196_v29  ;;  %v1132_v34 = vpop.f32.mrf.mxu0  ;;  %1183 = vmatprep.mubr.msk.f32.mxu0 %vm51_vm0, %v1333_v22 }
  0xec   :  { %1164 = vmatmul.mubr.msk.f32.gmra.mxu1 %vm51_vm0, %v1342_v25  ;;  %1186 = vmatprep.subr.mxu1 %v1129_v32 }
  0xed   :  { %1170 = vmatprep.mubr.msk.f32.mxu1 %vm51_vm0, %v1319_v18  ;;  %1196 = vmatprep.subr.mxu0 %v1132_v34  ;;  %v226_v35 = vpop.f32.mrf.mxu0 }
  0xee   :  { %1197 = vmatpush3.msra.mxu0 %v1132_v34 }
  0xef   :  { %1198 = vmatprep.subr.mxu0 %v226_v35  ;;  %1184 = vmatmul.mubr.msk.f32.gmra.mxu0 %vm51_vm0, %v1342_v25  ;;  %v1135_v36 = vpop.f32.mrf.mxu0 }
  0xf0   :  { %1171 = vmatmul.mubr.msk.f32.vlgmr.msra.gmra.mxu1 %vm51_vm0, %v1328_v21  ;;  %1199 = vmatpush3.msra.mxu0 %v226_v35 }
  0xf1   :  { %1187 = vmatpush3.msra.mxu1 %v1129_v32  ;;  %1173 = vmatprep.mubr.msk.f32.mxu1 %vm51_vm0, %v1333_v22  ;;  %v236_v37 = vpop.f32.mrf.mxu0 }
  0xf2   :  { %1188 = vmatprep.subr.mxu1 %v216_v33  ;;  %1200 = vmatprep.mubr.msk.f32.mxu0 %vm51_vm0, %v1319_v18 }
  0xf3   :  { %1189 = vmatpush3.msra.mxu1 %v216_v33  ;;  %1201 = vmatmul.mubr.msk.f32.vlgmr.msra.gmra.mxu0 %vm51_vm0, %v1328_v21 }
  0xf4   :  { %1174 = vmatmul.mubr.msk.f32.gmra.mxu1 %vm51_vm0, %v1342_v25  ;;  %1206 = vmatprep.subr.mxu1 %v1135_v36 }
  0xf5   :  { %1190 = vmatprep.mubr.msk.f32.mxu1 %vm51_vm0, %v1319_v18  ;;  %1203 = vmatprep.mubr.msk.f32.mxu0 %vm51_vm0, %v1333_v22 }
  0xf7   :  { %1204 = vmatmul.mubr.msk.f32.gmra.mxu0 %vm51_vm0, %v1342_v25 }
  0xf8   :  { %1191 = vmatmul.mubr.msk.f32.vlgmr.msra.gmra.mxu1 %vm51_vm0, %v1328_v21 }
  0xf9   :  { %1207 = vmatpush3.msra.mxu1 %v1135_v36  ;;  %1193 = vmatprep.mubr.msk.f32.mxu1 %vm51_vm0, %v1333_v22 }
  0xfa   :  { %1208 = vmatprep.subr.mxu1 %v236_v37 }
  0xfb   :  { %1209 = vmatpush3.msra.mxu1 %v236_v37 }
  0xfc   :  { %1194 = vmatmul.mubr.msk.f32.gmra.mxu1 %vm51_vm0, %v1342_v25 }
  0xfd   :  { %1210 = vmatprep.mubr.msk.f32.mxu1 %vm51_vm0, %v1319_v18 }
 0x100   :  { %1211 = vmatmul.mubr.msk.f32.vlgmr.msra.gmra.mxu1 %vm51_vm0, %v1328_v21 }
 0x101   :  { %1213 = vmatprep.mubr.msk.f32.mxu1 %vm51_vm0, %v1333_v22 }
 0x104   :  { %1214 = vmatmul.mubr.msk.f32.gmra.mxu1 %vm51_vm0, %v1342_v25 }
 0x198   :  { %v1142_v38 = vpop.f32.mrf.mxu1 }
 0x199   :  { %344 = vst.msk [vmem:[#allocation5 + $0x8] sm:$0xff] %vm342_vm1, %v1142_v38 }
 0x19a   :  { %v323_v39 = vpop.f32.mrf.mxu1 }
 0x19b   :  { %343 = vst.msk [vmem:[#allocation5] sm:$0xff] %vm342_vm1, %v323_v39 }
 0x19c   :  { %v1145_v40 = vpop.f32.mrf.mxu1 }
 0x19d   :  { %346 = vst.msk [vmem:[#allocation5 + $0x18] sm:$0xff] %vm342_vm1, %v1145_v40 }
 0x19e   :  { %v333_v41 = vpop.f32.mrf.mxu1 }
 0x19f   :  { %345 = vst.msk [vmem:[#allocation5 + $0x10] sm:$0xff] %vm342_vm1, %v333_v41 }
 0x1a0   :  { %v1152_v42 = vpop.f32.mrf.mxu1 }
 0x1a1   :  { %434 = vst.msk [vmem:[#allocation5 + $0x28] sm:$0xff] %vm342_vm1, %v1152_v42 }
 0x1a2   :  { %v413_v43 = vpop.f32.mrf.mxu1 }
 0x1a3   :  { %433 = vst.msk [vmem:[#allocation5 + $0x20] sm:$0xff] %vm342_vm1, %v413_v43 }
 0x1a4   :  { %v1155_v44 = vpop.f32.mrf.mxu1 }
 0x1a5   :  { %436 = vst.msk [vmem:[#allocation5 + $0x38] sm:$0xff] %vm342_vm1, %v1155_v44 }
 0x1a6   :  { %v423_v45 = vpop.f32.mrf.mxu1 }
 0x1a7   :  { %435 = vst.msk [vmem:[#allocation5 + $0x30] sm:$0xff] %vm342_vm1, %v423_v45 }
 0x1a8   :  { %v1162_v46 = vpop.f32.mrf.mxu1 }
 0x1a9   :  { %524 = vst.msk [vmem:[#allocation5 + $0x48] sm:$0xff] %vm342_vm1, %v1162_v46 }
 0x1aa   :  { %v503_v47 = vpop.f32.mrf.mxu1  ;;  %v1182_v48 = vpop.f32.mrf.mxu0 }
 0x1ab   :  { %523 = vst.msk [vmem:[#allocation5 + $0x40] sm:$0xff] %vm342_vm1, %v503_v47  ;;  %704 = vst.msk [vmem:[#allocation5 + $0x88] sm:$0xff] %vm342_vm1, %v1182_v48 }
 0x1ac   :  { %v1165_v49 = vpop.f32.mrf.mxu1  ;;  %v683_v50 = vpop.f32.mrf.mxu0 }
 0x1ad   :  { %526 = vst.msk [vmem:[#allocation5 + $0x58] sm:$0xff] %vm342_vm1, %v1165_v49  ;;  %703 = vst.msk [vmem:[#allocation5 + $0x80] sm:$0xff] %vm342_vm1, %v683_v50 }
 0x1ae   :  { %v513_v51 = vpop.f32.mrf.mxu1 }
 0x1af   :  { %525 = vst.msk [vmem:[#allocation5 + $0x50] sm:$0xff] %vm342_vm1, %v513_v51  ;;  %v1185_v52 = vpop.f32.mrf.mxu0 }
 0x1b0   :  { %v1172_v53 = vpop.f32.mrf.mxu1  ;;  %706 = vst.msk [vmem:[#allocation5 + $0x98] sm:$0xff] %vm342_vm1, %v1185_v52 }
 0x1b1   :  { %614 = vst.msk [vmem:[#allocation5 + $0x68] sm:$0xff] %vm342_vm1, %v1172_v53  ;;  %v693_v54 = vpop.f32.mrf.mxu0 }
 0x1b2   :  { %v593_v55 = vpop.f32.mrf.mxu1  ;;  %705 = vst.msk [vmem:[#allocation5 + $0x90] sm:$0xff] %vm342_vm1, %v693_v54 }
 0x1b3   :  { %613 = vst.msk [vmem:[#allocation5 + $0x60] sm:$0xff] %vm342_vm1, %v593_v55  ;;  %v1202_v56 = vpop.f32.mrf.mxu0 }
 0x1b4   :  { %v1175_v57 = vpop.f32.mrf.mxu1  ;;  %884 = vst.msk [vmem:[#allocation5 + $0xc8] sm:$0xff] %vm342_vm1, %v1202_v56 }
 0x1b5   :  { %616 = vst.msk [vmem:[#allocation5 + $0x78] sm:$0xff] %vm342_vm1, %v1175_v57  ;;  %v863_v58 = vpop.f32.mrf.mxu0 }
 0x1b6   :  { %v603_v59 = vpop.f32.mrf.mxu1  ;;  %883 = vst.msk [vmem:[#allocation5 + $0xc0] sm:$0xff] %vm342_vm1, %v863_v58 }
 0x1b7   :  { %615 = vst.msk [vmem:[#allocation5 + $0x70] sm:$0xff] %vm342_vm1, %v603_v59  ;;  %v1205_v60 = vpop.f32.mrf.mxu0 }
 0x1b8   :  { %v1192_v61 = vpop.f32.mrf.mxu1  ;;  %886 = vst.msk [vmem:[#allocation5 + $0xd8] sm:$0xff] %vm342_vm1, %v1205_v60 }
 0x1b9   :  { %794 = vst.msk [vmem:[#allocation5 + $0xa8] sm:$0xff] %vm342_vm1, %v1192_v61  ;;  %v873_v62 = vpop.f32.mrf.mxu0 }
 0x1ba   :  { %v773_v63 = vpop.f32.mrf.mxu1  ;;  %885 = vst.msk [vmem:[#allocation5 + $0xd0] sm:$0xff] %vm342_vm1, %v873_v62 }
 0x1bb   :  { %793 = vst.msk [vmem:[#allocation5 + $0xa0] sm:$0xff] %vm342_vm1, %v773_v63 }
 0x1bc   :  { %v1195_v0 = vpop.f32.mrf.mxu1 }
 0x1bd   :  { %796 = vst.msk [vmem:[#allocation5 + $0xb8] sm:$0xff] %vm342_vm1, %v1195_v0 }
 0x1be   :  { %v783_v1 = vpop.f32.mrf.mxu1 }
 0x1bf   :  { %795 = vst.msk [vmem:[#allocation5 + $0xb0] sm:$0xff] %vm342_vm1, %v783_v1 }
 0x1c0   :  { %v1212_v2 = vpop.f32.mrf.mxu1 }
 0x1c1   :  { %974 = vst.msk [vmem:[#allocation5 + $0xe8] sm:$0xff] %vm342_vm1, %v1212_v2 }
 0x1c2   :  { %v953_v3 = vpop.f32.mrf.mxu1 }
 0x1c3   :  { %973 = vst.msk [vmem:[#allocation5 + $0xe0] sm:$0xff] %vm342_vm1, %v953_v3 }
 0x1c4   :  { %v1215_v4 = vpop.f32.mrf.mxu1 }
 0x1c5   :  { %976 = vst.msk [vmem:[#allocation5 + $0xf8] sm:$0xff] %vm342_vm1, %v1215_v4 }
 0x1c6   :  { %v963_v5 = vpop.f32.mrf.mxu1 }
 0x1c7   :  { %975 = vst.msk [vmem:[#allocation5 + $0xf0] sm:$0xff] %vm342_vm1, %v963_v5 }
 0x1c8   :  { %1251 = shalt.err (!%p1248_p9)
}
 0x1c9   :  { %988 = dma.vmem_to_hbm [thread:$0]  %s983_s29, 4096, %s1441_s3, [#allocation4], %s1265_s15, %s1265_s15, %s1266_s16  }
 0x1ca   :  { %1262 = dma.done.wait [#allocation4], 4096  }
 0x1cb   :  { %1263 = vsyncadd [#allocation4], 4294963200 }
 0x1cc   :  { %992 = vsyncpa [#allocation3], 1 }
 0x1cd   :  { %993 = vsyncpa [#allocation4], 1 }

</bundles_post_ra>
